<compile_context>
chip_gen: v6e
topology: v6e:2x2x1
jax: 0.10.0
libtpu: 0.0.40
codegen_flags: <defaults>
</compile_context>

<pallas_src>
import functools

import jax
import jax.numpy as jnp
from jax.experimental import pallas as pl
from jax.experimental.pallas import tpu as pltpu


def _round_up(x, m):
    return (x + m - 1) // m * m


def disc_kernel(x_ref, w1_ref, b1_ref, w2_ref, b2_ref, w3_ref, b3_ref,
                o_ref, acc_ref, *, inv_s):
    """Grid = (batch_tiles, s_tiles); S is the pooling reduction axis."""
    s = pl.program_id(1)

    @pl.when(s == 0)
    def _init():
        acc_ref[...] = jnp.zeros_like(acc_ref)

    # Lane-wide partial sums: accumulate 128-lane slices of the x block with pure
    # VPU vreg adds into the f32 (TN, C, 128) scratch.  The expensive cross-lane
    # (XLU) reduce is deferred to the finalize branch, once per batch tile.
    ts = x_ref.shape[2]                       # static block extent (multiple of 128)
    for j in range(ts // 128):
        acc_ref[...] += x_ref[:, :, pl.ds(j * 128, 128)].astype(jnp.float32)

    @pl.when(s == pl.num_programs(1) - 1)
    def _finalize():
        # Single cross-lane reduce + mean scale (zero S-padding contributes 0).
        pooled = jnp.sum(acc_ref[...], axis=2) * inv_s          # (TN, C) f32
        # ReverseLayerF is identity in the forward pass; Dropout identity at eval.
        h = jnp.dot(pooled, w1_ref[...],
                    preferred_element_type=jnp.float32) + b1_ref[...]
        h = jnp.maximum(h, 0.0)
        h = jnp.dot(h, w2_ref[...],
                    preferred_element_type=jnp.float32) + b2_ref[...]
        h = jnp.maximum(h, 0.0)
        out = jnp.dot(h, w3_ref[...],
                      preferred_element_type=jnp.float32) + b3_ref[...]
        o_ref[...] = out.astype(o_ref.dtype)


def _device_defaults():
    """(max_x_block_bytes, vmem_limit_bytes) chosen per TPU generation."""
    kind = ""
    try:
        kind = jax.devices()[0].device_kind.lower()
    except Exception:
        pass
    if "v5" in kind or "v6" in kind:
        # 128 MiB physical VMEM: large blocks amortize the ~0.35 us per-step cost.
        return 16 * 1024 * 1024, 96 * 1024 * 1024
    if "v7" in kind:
        # 64 MiB physical VMEM per TC: stay well below once double-buffered.
        return 8 * 1024 * 1024, 48 * 1024 * 1024
    # Unknown generation: conservative block size, default scoped-VMEM limit.
    return 8 * 1024 * 1024, None


def domain_discriminator(x, w1, b1, w2, b2, w3, b3, *,
                         compute_dtype=jnp.float32,
                         batch_tile=None, s_tile=None,
                         max_x_block_bytes=None, vmem_limit_bytes=None):
    """x: (N, C, S) with S = T*H*W. Weights (in, out), biases (out,).

    Returns (N, domain_num) f32 logits of the DomainDiscriminator_MLP forward.
    """
    n, c, s = x.shape
    hidden = w1.shape[1]
    domain = w3.shape[1]
    itemsize = jnp.dtype(compute_dtype).itemsize

    default_block_bytes, default_vmem = _device_defaults()
    if max_x_block_bytes is None:
        max_x_block_bytes = default_block_bytes
    if vmem_limit_bytes is None:
        vmem_limit_bytes = default_vmem

    # --- tile selection -----------------------------------------------------
    # * >= 2 batch tiles so the "parallel" axis shards across v7x's two TCs.
    # * byte budget biased toward s_tile (longer contiguous HBM runs per row);
    #   s_tile covers full S whenever it fits, collapsing the S grid axis to 1.
    if batch_tile is None:
        batch_tile = min(64, _round_up(max(1, (n + 1) // 2), 8))
    batch_tile = _round_up(batch_tile, 8)
    if s_tile is None:
        budget = max(1, max_x_block_bytes // (batch_tile * c * itemsize))
        s_tile = max(128, (budget // 128) * 128)
        s_tile = min(_round_up(s, 128), s_tile)
    s_tile = _round_up(s_tile, 128)

    n_pad = _round_up(n, batch_tile)
    s_pad = _round_up(s, s_tile)
    hid_pad = _round_up(max(hidden, 128), 128)   # lane-dense intermediates
    dom_pad = _round_up(max(domain, 128), 128)   # lane-dense output stores

    # --- operand prep (cheap wrapper-side XLA ops) ----------------------------
    # Weights/biases stay f32; zero padding is exact through the ReLUs.
    w1p = jnp.zeros((c, hid_pad), jnp.float32).at[:, :hidden].set(w1)
    w2p = jnp.zeros((hid_pad, hid_pad), jnp.float32).at[:hidden, :hidden].set(w2)
    w3p = jnp.zeros((hid_pad, dom_pad), jnp.float32).at[:hidden, :domain].set(w3)
    b1p = jnp.zeros((1, hid_pad), jnp.float32).at[:, :hidden].set(b1.reshape(1, -1))
    b2p = jnp.zeros((1, hid_pad), jnp.float32).at[:, :hidden].set(b2.reshape(1, -1))
    b3p = jnp.zeros((1, dom_pad), jnp.float32).at[:, :domain].set(b3.reshape(1, -1))

    xp = x.astype(compute_dtype)
    if n_pad != n or s_pad != s:
        xp = jnp.pad(xp, ((0, n_pad - n), (0, 0), (0, s_pad - s)))

    grid = (n_pad // batch_tile, s_pad // s_tile)
    const = lambda i, si: (0, 0)   # weights/biases: VMEM-resident, single DMA

    kernel = functools.partial(disc_kernel, inv_s=1.0 / s)

    out = pl.pallas_call(
        kernel,
        out_shape=jax.ShapeDtypeStruct((n_pad, dom_pad), jnp.float32),
        grid_spec=pltpu.PrefetchScalarGridSpec(
            num_scalar_prefetch=0,
            grid=grid,
            in_specs=[
                pl.BlockSpec((batch_tile, c, s_tile), lambda i, si: (i, 0, si)),
                pl.BlockSpec((c, hid_pad), const),
                pl.BlockSpec((1, hid_pad), const),
                pl.BlockSpec((hid_pad, hid_pad), const),
                pl.BlockSpec((1, hid_pad), const),
                pl.BlockSpec((hid_pad, dom_pad), const),
                pl.BlockSpec((1, dom_pad), const),
            ],
            out_specs=pl.BlockSpec((batch_tile, dom_pad), lambda i, si: (i, 0)),
            scratch_shapes=[pltpu.VMEM((batch_tile, c, 128), jnp.float32)],
        ),
        compiler_params=pltpu.CompilerParams(
            # batch tiles are independent (v7x: each TC takes half of them);
            # S is the pooling reduction carried in scratch -> "arbitrary".
            dimension_semantics=("parallel", "arbitrary"),
            vmem_limit_bytes=vmem_limit_bytes,
        ),
    )(xp, w1p, b1p, w2p, b2p, w3p, b3p)

    return out[:n, :domain]


def _init_linear(key, fan_in, fan_out):
    # PyTorch nn.Linear default init: U(-1/sqrt(fan_in), 1/sqrt(fan_in))
    kw, kb = jax.random.split(key)
    bound = 1.0 / jnp.sqrt(float(fan_in))
    w = jax.random.uniform(kw, (fan_in, fan_out), jnp.float32, -bound, bound)
    b = jax.random.uniform(kb, (fan_out,), jnp.float32, -bound, bound)
    return w, b


def _reference(x, w1, b1, w2, b2, w3, b3):
    pooled = jnp.mean(x, axis=2)
    h = jnp.maximum(pooled @ w1 + b1, 0.0)
    h = jnp.maximum(h @ w2 + b2, 0.0)
    return h @ w3 + b3


if __name__ == "__main__":
    # Small shapes consistent with the module: batch=16, channels(input_dim)=32,
    # temporal=4, spatial=8x8 (S = T*H*W = 256), hidden_dim=64, domain_num=2.
    N, C, T, H, W = 16, 32, 4, 8, 8
    HIDDEN, DOMAIN = 64, 2

    key = jax.random.PRNGKey(0)
    kx, k1, k2, k3 = jax.random.split(key, 4)

    x5 = jax.random.normal(kx, (N, C, T, H, W), jnp.float32)   # NCTHW (PyTorch)
    x = x5.reshape(N, C, T * H * W)                            # kernel layout (N, C, S)

    w1, b1 = _init_linear(k1, C, HIDDEN)
    w2, b2 = _init_linear(k2, HIDDEN, HIDDEN)
    w3, b3 = _init_linear(k3, HIDDEN, DOMAIN)

    ref = _reference(x, w1, b1, w2, b2, w3, b3)

    # 1) f32 path, auto-selected tiles (>= 2 batch tiles, S axis collapsed).
    out = jax.block_until_ready(domain_discriminator(x, w1, b1, w2, b2, w3, b3))
    assert out.shape == (N, DOMAIN)
    assert jnp.allclose(out, ref, atol=1e-4, rtol=1e-4), "f32 mismatch vs reference"

    # 2) f32 path, forced small tiles -> exercises the (batch, S) grid, the
    #    lane-wide accumulator carry across S steps, and the N/S padding paths.
    out_t = jax.block_until_ready(
        domain_discriminator(x, w1, b1, w2, b2, w3, b3, batch_tile=8, s_tile=128))
    assert jnp.allclose(out_t, ref, atol=1e-4, rtol=1e-4), "tiled f32 mismatch"

    # 3) bf16 streaming path (halves x DMA bytes; most valuable on v5e's ~820 GB/s
    #    HBM).  Pooling, matmuls and weights all stay f32 -> x is rounded once.
    out_bf = jax.block_until_ready(
        domain_discriminator(x, w1, b1, w2, b2, w3, b3,
                             compute_dtype=jnp.bfloat16))
    assert jnp.allclose(out_bf, ref, atol=5e-2, rtol=5e-2), "bf16 mismatch"

    # TODO(synk): ReverseLayerF gradient reversal is backward-only; a custom_vjp
    # around this forward would be needed for training-time gradient flipping.
    print("KERNEL_OK")
</pallas_src>

<mosaic_0001>
module attributes {stable_mosaic.version = 11 : i64} {
  func.func @disc_kernel(%arg0: i32, %arg1: i32, %arg2: memref<8x32x256xf32, #tpu.memory_space<vmem>>, %arg3: memref<32x128xf32, #tpu.memory_space<vmem>>, %arg4: memref<1x128xf32, #tpu.memory_space<vmem>>, %arg5: memref<128x128xf32, #tpu.memory_space<vmem>>, %arg6: memref<1x128xf32, #tpu.memory_space<vmem>>, %arg7: memref<128x128xf32, #tpu.memory_space<vmem>>, %arg8: memref<1x128xf32, #tpu.memory_space<vmem>>, %arg9: memref<8x128xf32, #tpu.memory_space<vmem>>, %arg10: memref<8x32x128xf32, #tpu.memory_space<vmem>>) attributes {dimension_semantics = [#tpu.dimension_semantics<parallel>, #tpu.dimension_semantics<arbitrary>], iteration_bounds = array<i64: 2, 1>, scalar_prefetch = 0 : i64, scratch_operands = 1 : i64, tpu.core_type = #tpu.core_type<tc>, window_params = [{transform_indices = @transform_0, window_bounds = array<i64: 8, 32, 256>}, {pipeline_mode = #tpu.pipeline_mode<synchronous>, transform_indices = @transform_1, window_bounds = array<i64: 32, 128>}, {pipeline_mode = #tpu.pipeline_mode<synchronous>, transform_indices = @transform_2, window_bounds = array<i64: 1, 128>}, {pipeline_mode = #tpu.pipeline_mode<synchronous>, transform_indices = @transform_3, window_bounds = array<i64: 128, 128>}, {pipeline_mode = #tpu.pipeline_mode<synchronous>, transform_indices = @transform_4, window_bounds = array<i64: 1, 128>}, {pipeline_mode = #tpu.pipeline_mode<synchronous>, transform_indices = @transform_5, window_bounds = array<i64: 128, 128>}, {pipeline_mode = #tpu.pipeline_mode<synchronous>, transform_indices = @transform_6, window_bounds = array<i64: 1, 128>}, {transform_indices = @transform_7, window_bounds = array<i64: 8, 128>}]} {
    %c0_i32 = arith.constant 0 : i32
    %0 = arith.cmpi eq, %arg1, %c0_i32 : i32
    %1 = arith.extui %0 : i1 to i32
    %c0_i32_0 = arith.constant 0 : i32
    %2 = arith.cmpi ne, %1, %c0_i32_0 : i32
    scf.if %2 {
      %cst = arith.constant 0.000000e+00 : f32
      %14 = vector.broadcast %cst : f32 to vector<8x32x128xf32>
      %c0_19 = arith.constant 0 : index
      %c0_20 = arith.constant 0 : index
      %c0_21 = arith.constant 0 : index
      %15 = vector.load %arg10[%c0_19, %c0_20, %c0_21] : memref<8x32x128xf32, #tpu.memory_space<vmem>>, vector<8x32x128xf32>
      tpu.vector_store %arg10[%c0_19, %c0_20, %c0_21], %14 {strides = array<i32>} : memref<8x32x128xf32, #tpu.memory_space<vmem>>, vector<8x32x128xf32>,
    } else {
    }
    %c0 = arith.constant 0 : index
    %c0_1 = arith.constant 0 : index
    %c0_2 = arith.constant 0 : index
    %3 = vector.load %arg10[%c0, %c0_1, %c0_2] : memref<8x32x128xf32, #tpu.memory_space<vmem>>, vector<8x32x128xf32>
    %c0_3 = arith.constant 0 : index
    %c0_4 = arith.constant 0 : index
    %c0_5 = arith.constant 0 : index
    %4 = vector.load %arg2[%c0_3, %c0_4, %c0_5] : memref<8x32x256xf32, #tpu.memory_space<vmem>>, vector<8x32x128xf32>
    %5 = arith.addf %3, %4 : vector<8x32x128xf32>
    %c0_6 = arith.constant 0 : index
    %c0_7 = arith.constant 0 : index
    %c0_8 = arith.constant 0 : index
    %6 = vector.load %arg10[%c0_6, %c0_7, %c0_8] : memref<8x32x128xf32, #tpu.memory_space<vmem>>, vector<8x32x128xf32>
    tpu.vector_store %arg10[%c0_6, %c0_7, %c0_8], %5 {strides = array<i32>} : memref<8x32x128xf32, #tpu.memory_space<vmem>>, vector<8x32x128xf32>,
    %c0_9 = arith.constant 0 : index
    %c0_10 = arith.constant 0 : index
    %c0_11 = arith.constant 0 : index
    %7 = vector.load %arg10[%c0_9, %c0_10, %c0_11] : memref<8x32x128xf32, #tpu.memory_space<vmem>>, vector<8x32x128xf32>
    %c0_12 = arith.constant 0 : index
    %c0_13 = arith.constant 0 : index
    %c128 = arith.constant 128 : index
    %8 = vector.load %arg2[%c0_12, %c0_13, %c128] : memref<8x32x256xf32, #tpu.memory_space<vmem>>, vector<8x32x128xf32>
    %9 = arith.addf %7, %8 : vector<8x32x128xf32>
    %c0_14 = arith.constant 0 : index
    %c0_15 = arith.constant 0 : index
    %c0_16 = arith.constant 0 : index
    %10 = vector.load %arg10[%c0_14, %c0_15, %c0_16] : memref<8x32x128xf32, #tpu.memory_space<vmem>>, vector<8x32x128xf32>
    tpu.vector_store %arg10[%c0_14, %c0_15, %c0_16], %9 {strides = array<i32>} : memref<8x32x128xf32, #tpu.memory_space<vmem>>, vector<8x32x128xf32>,
    %c0_i32_17 = arith.constant 0 : i32
    %11 = arith.cmpi eq, %arg1, %c0_i32_17 : i32
    %12 = arith.extui %11 : i1 to i32
    %c0_i32_18 = arith.constant 0 : i32
    %13 = arith.cmpi ne, %12, %c0_i32_18 : i32
    scf.if %13 {
      %c0_19 = arith.constant 0 : index
      %c0_20 = arith.constant 0 : index
      %c0_21 = arith.constant 0 : index
      %14 = vector.load %arg10[%c0_19, %c0_20, %c0_21] : memref<8x32x128xf32, #tpu.memory_space<vmem>>, vector<8x32x128xf32>
      %cst = arith.constant dense<0.000000e+00> : vector<8x32xf32>
      %15 = vector.multi_reduction <add>, %14, %cst [2] : vector<8x32x128xf32> to vector<8x32xf32>
      %cst_22 = arith.constant 3.906250e-03 : f32
      %16 = vector.broadcast %cst_22 : f32 to vector<8x32xf32>
      %17 = arith.mulf %15, %16 : vector<8x32xf32>
      %c0_23 = arith.constant 0 : index
      %c0_24 = arith.constant 0 : index
      %18 = vector.load %arg3[%c0_23, %c0_24] : memref<32x128xf32, #tpu.memory_space<vmem>>, vector<32x128xf32>
      %cst_25 = arith.constant dense<0.000000e+00> : vector<8x128xf32>
      %19 = tpu.matmul %17, %18, %cst_25 {dimension_numbers = #tpu.dot_dimension_numbers<[1], [0], [0], [1], [0, 0, 1, 1], [], []>} : vector<8x32xf32>, vector<32x128xf32>, vector<8x128xf32> -> vector<8x128xf32>
      %c0_26 = arith.constant 0 : index
      %c0_27 = arith.constant 0 : index
      %20 = vector.load %arg4[%c0_26, %c0_27] : memref<1x128xf32, #tpu.memory_space<vmem>>, vector<1x128xf32>
      %21 = vector.broadcast %20 : vector<1x128xf32> to vector<8x128xf32>
      %22 = arith.addf %19, %21 : vector<8x128xf32>
      %cst_28 = arith.constant 0.000000e+00 : f32
      %23 = vector.broadcast %cst_28 : f32 to vector<8x128xf32>
      %24 = arith.maximumf %22, %23 : vector<8x128xf32>
      %c0_29 = arith.constant 0 : index
      %c0_30 = arith.constant 0 : index
      %25 = vector.load %arg5[%c0_29, %c0_30] : memref<128x128xf32, #tpu.memory_space<vmem>>, vector<128x128xf32>
      %cst_31 = arith.constant dense<0.000000e+00> : vector<8x128xf32>
      %26 = tpu.matmul %24, %25, %cst_31 {dimension_numbers = #tpu.dot_dimension_numbers<[1], [0], [0], [1], [0, 0, 1, 1], [], []>} : vector<8x128xf32>, vector<128x128xf32>, vector<8x128xf32> -> vector<8x128xf32>
      %c0_32 = arith.constant 0 : index
      %c0_33 = arith.constant 0 : index
      %27 = vector.load %arg6[%c0_32, %c0_33] : memref<1x128xf32, #tpu.memory_space<vmem>>, vector<1x128xf32>
      %28 = vector.broadcast %27 : vector<1x128xf32> to vector<8x128xf32>
      %29 = arith.addf %26, %28 : vector<8x128xf32>
      %cst_34 = arith.constant 0.000000e+00 : f32
      %30 = vector.broadcast %cst_34 : f32 to vector<8x128xf32>
      %31 = arith.maximumf %29, %30 : vector<8x128xf32>
      %c0_35 = arith.constant 0 : index
      %c0_36 = arith.constant 0 : index
      %32 = vector.load %arg7[%c0_35, %c0_36] : memref<128x128xf32, #tpu.memory_space<vmem>>, vector<128x128xf32>
      %cst_37 = arith.constant dense<0.000000e+00> : vector<8x128xf32>
      %33 = tpu.matmul %31, %32, %cst_37 {dimension_numbers = #tpu.dot_dimension_numbers<[1], [0], [0], [1], [0, 0, 1, 1], [], []>} : vector<8x128xf32>, vector<128x128xf32>, vector<8x128xf32> -> vector<8x128xf32>
      %c0_38 = arith.constant 0 : index
      %c0_39 = arith.constant 0 : index
      %34 = vector.load %arg8[%c0_38, %c0_39] : memref<1x128xf32, #tpu.memory_space<vmem>>, vector<1x128xf32>
      %35 = vector.broadcast %34 : vector<1x128xf32> to vector<8x128xf32>
      %36 = arith.addf %33, %35 : vector<8x128xf32>
      %c0_40 = arith.constant 0 : index
      %c0_41 = arith.constant 0 : index
      %37 = vector.load %arg9[%c0_40, %c0_41] : memref<8x128xf32, #tpu.memory_space<vmem>>, vector<8x128xf32>
      tpu.vector_store %arg9[%c0_40, %c0_41], %36 {strides = array<i32>} : memref<8x128xf32, #tpu.memory_space<vmem>>, vector<8x128xf32>,
    } else {
    }
    return
  }
  func.func @transform_0(%arg0: i32, %arg1: i32) -> (i32, i32, i32) {
    %c0_i32 = arith.constant 0 : i32
    %c0_i32_0 = arith.constant 0 : i32
    return %arg0, %c0_i32, %arg1 : i32, i32, i32
  }
  func.func @transform_1(%arg0: i32, %arg1: i32) -> (i32, i32) {
    %c0_i32 = arith.constant 0 : i32
    %c0_i32_0 = arith.constant 0 : i32
    %c0_i32_1 = arith.constant 0 : i32
    return %c0_i32, %c0_i32_0 : i32, i32
  }
  func.func @transform_2(%arg0: i32, %arg1: i32) -> (i32, i32) {
    %c0_i32 = arith.constant 0 : i32
    %c0_i32_0 = arith.constant 0 : i32
    %c0_i32_1 = arith.constant 0 : i32
    return %c0_i32, %c0_i32_0 : i32, i32
  }
  func.func @transform_3(%arg0: i32, %arg1: i32) -> (i32, i32) {
    %c0_i32 = arith.constant 0 : i32
    %c0_i32_0 = arith.constant 0 : i32
    %c0_i32_1 = arith.constant 0 : i32
    return %c0_i32, %c0_i32_0 : i32, i32
  }
  func.func @transform_4(%arg0: i32, %arg1: i32) -> (i32, i32) {
    %c0_i32 = arith.constant 0 : i32
    %c0_i32_0 = arith.constant 0 : i32
    %c0_i32_1 = arith.constant 0 : i32
    return %c0_i32, %c0_i32_0 : i32, i32
  }
  func.func @transform_5(%arg0: i32, %arg1: i32) -> (i32, i32) {
    %c0_i32 = arith.constant 0 : i32
    %c0_i32_0 = arith.constant 0 : i32
    %c0_i32_1 = arith.constant 0 : i32
    return %c0_i32, %c0_i32_0 : i32, i32
  }
  func.func @transform_6(%arg0: i32, %arg1: i32) -> (i32, i32) {
    %c0_i32 = arith.constant 0 : i32
    %c0_i32_0 = arith.constant 0 : i32
    %c0_i32_1 = arith.constant 0 : i32
    return %c0_i32, %c0_i32_0 : i32, i32
  }
  func.func @transform_7(%arg0: i32, %arg1: i32) -> (i32, i32) {
    %c0_i32 = arith.constant 0 : i32
    %c0_i32_0 = arith.constant 0 : i32
    return %arg0, %c0_i32 : i32, i32
  }
}

</mosaic_0001>

<bundles_post_ra>
// kernel: tpu_custom_call.1
= control target key start
LH: loop header
LB: loop body
LE: loop exit
PB: predicated region body
PF: predicated region fallthrough
CT: control target
= control target key end

     0   :  { %s2262_s0 = inlined_call_operand.hbm [shape: f32[16,32,256], index: 0, kind: input, shape index: {}]   ;;  %s2263_s1 = inlined_call_operand.hbm [shape: f32[32,128], index: 1, kind: input, shape index: {}]   ;;  %s2264_s2 = inlined_call_operand.vmem [shape: f32[1,128], index: 2, kind: input, shape index: {}]   ;;  %s2265_s3 = inlined_call_operand.hbm [shape: f32[128,128], index: 3, kind: input, shape index: {}]   ;;  %s2266_s4 = inlined_call_operand.vmem [shape: f32[1,128], index: 4, kind: input, shape index: {}]   ;;  %s2267_s5 = inlined_call_operand.hbm [shape: f32[128,128], index: 5, kind: input, shape index: {}]   ;;  %s2268_s6 = inlined_call_operand.vmem [shape: f32[1,128], index: 6, kind: input, shape index: {}]   ;;  %s2269_s7 = inlined_call_operand.hbm [shape: f32[16,128], index: 7, kind: output, shape index: {}]  }
   0x1   :  { %2274 = sst [smem:[#allocation16_spill]] %s2263_s1 }
   0x2   :  { %2275 = sst [smem:[#allocation17_spill]] %s2265_s3 }
   0x3   :  { %2276 = sst [smem:[#allocation18_spill]] %s2267_s5 }
   0x4   :  { %12 = vsyncpa [#allocation4], 0 }
   0x5   :  { %14 = vsyncpa [#allocation4 + $0x1], 0 }
   0x6   :  { %15 = vsyncpa [#allocation7], 0 }
   0x7   :  { %16 = vsyncpa [#allocation10], 0 }
   0x8   :  { %17 = vsyncpa [#allocation5], 0 }
   0x9   :  { %19 = vsyncpa [#allocation5 + $0x1], 0  ;;  %s1879_s24 = smov 0   ;;  %s1881_s25 = smov 0  }
   0xa   :  { %s1883_s26 = smov 0   ;;  %s1885_s27 = smov 0  }
   0xb   :  { %s1887_s28 = smov 0   ;;  %s1889_s29 = smov 0  }
   0xc LB: > { %s1386_s30 = sadd.s32 4294967295, %s1826_s29   ;;  %s1387_s8 = sadd.s32 4294967294, %s1826_s29   ;;  %s1826_s29 = sphi %s1889_s29, %s25_s29   ;;  %s1822_s28 = sphi %s1887_s28, %s2297_s28   ;;  %s1818_s27 = sphi %s1885_s27, %s2296_s27   ;;  %s1814_s26 = sphi %s1883_s26, %s2295_s26   ;;  %s1810_s25 = sphi %s1881_s25, %s2294_s25   ;;  %s1806_s24 = sphi %s1879_s24, %s2293_s24  }
   0xd   : > { %p59_p0 = scmp.ne.s32.totalorder %s1810_s25, %s1806_s24  ;;  %p1913_p1 = scmp.eq.s32.totalorder %s1386_s30, 0 }
   0xe   : > { %p1917_p2 = scmp.eq.s32.totalorder %s1386_s30, 1  ;;  %p215_p3 = scmp.eq.s32.totalorder %s1387_s8, 1 }
   0xf   : > { %s2277_s9 = scalar_select %p1913_p1, 1, 0 }
  0x10   : > { %p1923_p4 = por %p1913_p1, %p59_p0  ;;  %p1388_p5 = scmp.ge.s32.totalorder %s1826_s29, 1 }
  0x11   : > { %p1928_p6 = por %p215_p3, %p59_p0  ;;  %p222_p7 = scmp.lt.s32.totalorder %s1826_s29, 3 }
  0x12   : > { %s2279_s11 = scalar_select %p1923_p4, 1, 0 }
  0x13   : > { %s2280_s12 = scalar_select %p1928_p6, 1, 0 }
  0x14   : > { %p1933_p8 = pnand %p1388_p5, %p222_p7  ;;  %s1828_s14 = smov [#allocation6]  }
  0x15   : > { %s234_s15 = sshll.u32 %s1828_s14, 4  ;;  %s1829_s17 = smov [#allocation8]   ;;  %s235_s15 = int_to_ptr.vmem [resolvable:$true] %s234_s15 }
  0x16   : > { %s2281_s13 = scalar_select %p1933_p8, 1, 0 }
  0x17   : > { %p1549_p9 = pneg %p1933_p8  ;;  %s250_s18 = sshll.u32 %s1829_s17, 4  ;;  %s251_s18 = int_to_ptr.vmem [resolvable:$true] %s250_s18 }
  0x18   : > { %s1830_s19 = smov [#allocation9]   ;;  %s1643_s21 = scalar_lea.vmem %s235_s15, 512 }
  0x19   : > { %p1942_p11 = pnand %p1549_p9, %p1913_p1  ;;  %s266_s20 = sshll.u32 %s1830_s19, 4  ;;  %s267_s20 = int_to_ptr.vmem [resolvable:$true] %s266_s20 }
  0x1a   : > { %p1644_p13 = scmp.ne.s32.totalorder %s235_s15, %s1643_s21  ;;  %p1651_p5 = scmp.lt.s32.totalorder %s235_s15, %s235_s15 }
  0x1b   : > { %p1634_p12 = pneg %p1942_p11  ;;  %p1652_p7 = scmp.lt.s32.totalorder %s1643_s21, %s1643_s21 }
  0x1d   : > { %p1646_p0 = pnand %p1644_p13, %p1634_p12  ;;  %p1653_p9 = por %p1652_p7, %p1651_p5 }
  0x1f   : > { %p1647_p3 = pneg %p1646_p0 }
  0x21   : > { %p1654_p10 = pnand %p1653_p9, %p1647_p3 }
  0x23   : > { %1657 = shalt.err (!%p1654_p10)
}
  0x24   : > { %s1831_s22 = smov 128   ;;  %s1832_s23 = smov 8  }
  0x25   : > { %s2283_s1 = sld [smem:[#allocation16_spill]]  ;;  %s1669_s14 = scalar_lea.vmem %s251_s18, 2048 }
  0x26   : > { %p1670_p6 = scmp.ne.s32.totalorder %s251_s18, %s1669_s14  ;;  %p1677_p1 = scmp.lt.s32.totalorder %s251_s18, %s251_s18 }
  0x27   : > { %p1678_p4 = scmp.lt.s32.totalorder %s1669_s14, %s1669_s14 }
  0x28   : > { %p1672_p13 = pnand %p1670_p6, %p1634_p12 }
  0x29   : > { %p1679_p5 = por %p1678_p4, %p1677_p1 }
  0x2a   : > { %p1673_p0 = pneg %p1672_p13 }
  0x2b   : > { %1552 = dma.hbm_to_vmem [thread:$0]  (!%p1942_p11), %s2283_s1, 512, %s235_s15, [#allocation7], %s1831_s22, %s1831_s22, %s1832_s23  }
  0x2c   : > { %p1680_p3 = pnand %p1679_p5, %p1673_p0 }
  0x2e   : > { %1683 = shalt.err (!%p1680_p3)
}
  0x2f   : > { %s2284_s3 = sld [smem:[#allocation17_spill]]  ;;  %s1695_s15 = scalar_lea.vmem %s267_s20, 2048 }
  0x30   : > { %p1696_p10 = scmp.ne.s32.totalorder %s267_s20, %s1695_s15  ;;  %p1703_p9 = scmp.lt.s32.totalorder %s267_s20, %s267_s20 }
  0x31   : > { %p1704_p13 = scmp.lt.s32.totalorder %s1695_s15, %s1695_s15 }
  0x32   : > { %p1698_p7 = pnand %p1696_p10, %p1634_p12 }
  0x33   : > { %p1705_p8 = por %p1704_p13, %p1703_p9 }
  0x34   : > { %p1699_p6 = pneg %p1698_p7 }
  0x35   : > { %1555 = dma.hbm_to_vmem [thread:$0]  (!%p1942_p11), %s2284_s3, 2048, %s251_s18, [#allocation7], %s1831_s22, %s1831_s22, %s1832_s23  }
  0x36   : > { %p1706_p1 = pnand %p1705_p8, %p1699_p6 }
  0x38   : > { %1709 = shalt.err (!%p1706_p1)
}
  0x39   : > { %s2285_s5 = sld [smem:[#allocation18_spill]]  ;;  %s46_s18 = sadd.s32 1, %s1814_s26 }
  0x3a   : > { %s37_s8 = sadd.s32 1, %s1822_s28  ;;  %p53_p4 = scmp.ne.s32.totalorder %s1814_s26, %s1810_s25 }
  0x3b   : > { %p39_p8 = scmp.ge.s32.totalorder %s37_s8, 2  ;;  %p54_p12 = scmp.eq.s32.totalorder %s1826_s29, 0 }
  0x3c   : > { %p1979_p0 = por %p1917_p2, %p53_p4  ;;  %p1570_p5 = scmp.lt.s32.totalorder %s1826_s29, 2 }
  0x3d   : > { %s2299_s8 = smov (%p39_p8, %s37_s8), 0  ;;  %p55_p3 = por %p54_p12, %p53_p4 }
  0x3e   : > { %s283_s14 = sand.u32 1, %s1814_s26   ;;  %s41_s17 = ssub.s32 %s1822_s28, %s2299_s8 }
  0x3f   : > { %1558 = dma.hbm_to_vmem [thread:$0]  (!%p1942_p11), %s2285_s5, 2048, %s267_s20, [#allocation10], %s1831_s22, %s1831_s22, %s1832_s23  }
  0x40   : > { %p44_p10 = scmp.eq.s32.totalorder %s41_s17, 0  ;;  %s1393_s20 = sshll.u32 %s283_s14, 9 }
  0x41   : > { %s1412_s22 = sshll.u32 %s1822_s28, 13  ;;  %s287_s21 = scalar_lea.vmem [#allocation3], %s1393_s20 }
  0x42   : > { %s1991_s23 = scalar_select %p44_p10, %s1814_s26, %s46_s18  }
  0x43   : > { %s296_s10 = scalar_lea.hbm %s2262_s0, %s1412_s22  ;;  %s297_s30 = sshll.u32 %s287_s21, 4  ;;  %s298_s30 = int_to_ptr.vmem [resolvable:$true] %s297_s30 }
  0x44   : > { %p1998_p2 = pnand %p1570_p5, %p55_p3  ;;  %s284_s3 = scalar_lea.sflag [#allocation4], %s283_s14 }
  0x45   : > { %s1723_s17 = scalar_lea.vmem %s298_s30, 8192  ;;  %s1833_s18 = smov [#allocation3]  }
  0x46   : > { %p1712_p11 = pneg %p1998_p2  ;;  %p1724_p7 = scmp.ne.s32.totalorder %s298_s30, %s1723_s17 }
  0x47   : > { %s1728_s5 = sshll.u32 %s1833_s18, 4  ;;  %s1729_s5 = int_to_ptr.vmem [resolvable:$false] %s1728_s5 }
  0x48   : > { %p1726_p6 = pnand %p1724_p7, %p1712_p11  ;;  %s1730_s22 = scalar_lea.vmem %s1729_s5, 16384 }
  0x49   : > { %p1731_p13 = scmp.lt.s32.totalorder %s298_s30, %s1729_s5  ;;  %p1732_p1 = scmp.lt.s32.totalorder %s1730_s22, %s1723_s17 }
  0x4a   : > { %p1727_p9 = pneg %p1726_p6 }
  0x4b   : > { %p1733_p4 = por %p1732_p1, %p1731_p13 }
  0x4d   : > { %p1734_p8 = pnand %p1733_p4, %p1727_p9 }
  0x4f   : > { %1737 = shalt.err (!%p1734_p8)
}
  0x50   : > { %s1834_s20 = smov 256   ;;  %s1835_s19 = smov 16  }
  0x51   : > { %1562 = dma.hbm_to_vmem [thread:$0]  (!%p1998_p2), %s296_s10, 8192, %s298_s30, %s284_s3, %s1834_s20, %s1834_s20, %s1835_s19  }
  0x52   : > { %p2288_p12 = scmp.ne.s32.totalorder %s2281_s13, 0 }
  0x53   : > { %s2009_s14 = sand.u32 (!%p2288_p12), 1, %s1810_s25   ;;  %p2289_p5 = scmp.ne.s32.totalorder (!%p2288_p12), %s2279_s11, 0 }
  0x54   : > { %309 = sbr.rel (%p2288_p12) target bundleno = 906 (0x38a), region = 48  ;;  %s1398_s15 = sshll.u32 (!%p2288_p12), %s2009_s14, 9 }
  0x55   : > { %s312_s5 = scalar_lea.sflag (!%p2288_p12), [#allocation4], %s2009_s14  ;;  %s2013_s21 = scalar_lea.vmem (!%p2288_p12), [#allocation3], %s1398_s15 }
  0x59   : > { %1789 = dma.done.wait (%p2289_p5), %s312_s5, 8192  }
  0x5a   : > { %1791 = vsyncadd (%p2289_p5), %s312_s5, 4294959104  ;;  %p2290_p3 = scmp.ne.s32.totalorder %s2277_s9, 0 }
  0x5c   : > { %1793 = dma.done.wait (%p2290_p3), [#allocation7], 2560  }
  0x5d   : > { %1795 = vsyncadd (%p2290_p3), [#allocation7], 4294964736 }
  0x5e   : > { %1797 = dma.done.wait (%p2290_p3), [#allocation10], 2048  }
  0x5f   : > { %1799 = vsyncadd (%p2290_p3), [#allocation10], 4294965248  ;;  %v432_v0 = vld [vmem:[%s2013_s21 + $0x40] sm:$0xff]  ;;  %v560_v1 = vld [vmem:[%s2013_s21 + $0x48] sm:$0xff]  ;;  %vm1837_vm0 = vmmov 0   ;;  %vm837_vm1 = vcmask 130112  }
  0x60   : > { %v428_v2 = vld [vmem:[%s2013_s21] sm:$0xff]  ;;  %v592_v3 = vadd.f32 %v560_v1, %v432_v0  ;;  %v556_v4 = vld [vmem:[%s2013_s21 + $0x8] sm:$0xff]  ;;  %v433_v5 = vld [vmem:[%s2013_s21 + $0x50] sm:$0xff]  ;;  %vm844_vm2 = vcmask 195712   ;;  %vm851_vm3 = vcmask 261312   ;;  %vm986_vm4 = vcmask 1041409  }
  0x61   : > { %v561_v6 = vld [vmem:[%s2013_s21 + $0x58] sm:$0xff]  ;;  %v588_v7 = vadd.f32 %v556_v4, %v428_v2  ;;  %v429_v8 = vld [vmem:[%s2013_s21 + $0x10] sm:$0xff]  ;;  %v434_v12 = vld [vmem:[%s2013_s21 + $0x60] sm:$0xff]  ;;  %vm988_vm5 = vcmask 1042434   ;;  %vm990_vm6 = vcmask 1043459   ;;  %vm992_vm7 = vcmask 1044484  }
  0x62   : > { %v557_v9 = vld [vmem:[%s2013_s21 + $0x18] sm:$0xff]  ;;  %695 = vadd.xlane.f32.xlu1 %v592_v3  ;;  %v593_v10 = vadd.f32 %v561_v6, %v433_v5  ;;  %v562_v13 = vld [vmem:[%s2013_s21 + $0x68] sm:$0xff]  ;;  %v430_v14 = vld [vmem:[%s2013_s21 + $0x20] sm:$0xff]  ;;  %vm994_vm8 = vcmask 1045509   ;;  %vm996_vm9 = vcmask 1046534   ;;  %vm998_vm10 = vcmask 1047559  }
  0x63   : > { %687 = vadd.xlane.f32.xlu0 %v588_v7  ;;  %v589_v11 = vadd.f32 %v557_v9, %v429_v8  ;;  %v558_v15 = vld [vmem:[%s2013_s21 + $0x28] sm:$0xff]  ;;  %v594_v16 = vadd.f32 %v562_v13, %v434_v12  ;;  %v437_v18 = vld [vmem:[%s2013_s21 + $0x90] sm:$0xff]  ;;  %v565_v19 = vld [vmem:[%s2013_s21 + $0x98] sm:$0xff]  ;;  %vm1000_vm11 = vcmask 261120   ;;  %s1402_s13 = sshll.u32 %s2009_s14, 3  ;;  %s1408_s17 = sshll.u32 %s1818_s27, 7 }
  0x64   : > { %v590_v17 = vadd.f32 %v558_v15, %v430_v14  ;;  %v436_v20 = vld [vmem:[%s2013_s21 + $0x80] sm:$0xff]  ;;  %v564_v21 = vld [vmem:[%s2013_s21 + $0x88] sm:$0xff]  ;;  %v597_v22 = vadd.f32 %v565_v19, %v437_v18  ;;  %v435_v24 = vld [vmem:[%s2013_s21 + $0x70] sm:$0xff]  ;;  %s357_s18 = scalar_lea.vmem [#allocation11], %s1402_s13  ;;  %s2220_s15 = scalar_lea.hbm %s2269_s7, %s1408_s17 }
  0x65   : > { %v596_v23 = vadd.f32 %v564_v21, %v436_v20  ;;  %v563_v25 = vld [vmem:[%s2013_s21 + $0x78] sm:$0xff]  ;;  %v431_v26 = vld [vmem:[%s2013_s21 + $0x30] sm:$0xff]  ;;  %v440_v30 = vld [vmem:[%s2013_s21 + $0xc0] sm:$0xff]  ;;  %s1276_s22 = sshll.u32 %s357_s18, 4  ;;  %s1263_s5 = scalar_lea.sflag [#allocation5], %s2009_s14  ;;  %s1277_s22 = int_to_ptr.vmem [resolvable:$true] %s1276_s22 }
  0x66   : > { %697 = vadd.xlane.f32.xlu1 %v593_v10  ;;  %v559_v27 = vld [vmem:[%s2013_s21 + $0x38] sm:$0xff]  ;;  %v595_v28 = vadd.f32 %v563_v25, %v435_v24  ;;  %v568_v31 = vld [vmem:[%s2013_s21 + $0xc8] sm:$0xff]  ;;  %v438_v32 = vld [vmem:[%s2013_s21 + $0xa0] sm:$0xff]  ;;  %s1838_s1 = smov [#allocation11]  }
  0x67   : > { %689 = vadd.xlane.f32.xlu0 %v589_v11  ;;  %v591_v29 = vadd.f32 %v559_v27, %v431_v26  ;;  %v566_v33 = vld [vmem:[%s2013_s21 + $0xa8] sm:$0xff]  ;;  %v600_v34 = vadd.f32 %v568_v31, %v440_v30  ;;  %v439_v36 = vld [vmem:[%s2013_s21 + $0xb0] sm:$0xff]  ;;  %v567_v37 = vld [vmem:[%s2013_s21 + $0xb8] sm:$0xff]  ;;  %s1742_s27 = sshll.u32 %s1838_s1, 4  ;;  %s1743_s27 = int_to_ptr.vmem [resolvable:$false] %s1742_s27 }
  0x68   : > { %v598_v35 = vadd.f32 %v566_v33, %v438_v32  ;;  %v441_v38 = vld [vmem:[%s2013_s21 + $0xd0] sm:$0xff]  ;;  %v569_v39 = vld [vmem:[%s2013_s21 + $0xd8] sm:$0xff]  ;;  %v599_v40 = vadd.f32 %v567_v37, %v439_v36  ;;  %v444_v42 = vld [vmem:[%s2013_s21 + $0x100] sm:$0xff]  ;;  %v1836_v32 = vmov 0.0   ;;  %s1744_s3 = scalar_lea.vmem %s1743_s27, 256  ;;  %p1745_p7 = scmp.lt.s32.totalorder %s1277_s22, %s1743_s27 }
  0x69   : > { %v601_v41 = vadd.f32 %v569_v39, %v441_v38  ;;  %v572_v43 = vld [vmem:[%s2013_s21 + $0x108] sm:$0xff]  ;;  %v442_v44 = vld [vmem:[%s2013_s21 + $0xe0] sm:$0xff]  ;;  %v443_v48 = vld [vmem:[%s2013_s21 + $0xf0] sm:$0xff]  ;;  %1452 = vmatprep.subr.mxu0 %v1836_v32  ;;  %1463 = vmatprep.subr.mxu1 %v1836_v32 }
  0x6a   : > { %699 = vadd.xlane.f32.xlu1 %v594_v16  ;;  %v570_v45 = vld [vmem:[%s2013_s21 + $0xe8] sm:$0xff]  ;;  %v604_v46 = vadd.f32 %v572_v43, %v444_v42  ;;  %v571_v49 = vld [vmem:[%s2013_s21 + $0xf8] sm:$0xff]  ;;  %v445_v50 = vld [vmem:[%s2013_s21 + $0x110] sm:$0xff]  ;;  %1460 = vmatprep.mubr.msk.f32.mxu0 %vm1837_vm0, %v1836_v32 }
  0x6b   : > { %691 = vadd.xlane.f32.xlu0 %v590_v17  ;;  %v602_v47 = vadd.f32 %v570_v45, %v442_v44  ;;  %v573_v51 = vld [vmem:[%s2013_s21 + $0x118] sm:$0xff]  ;;  %v603_v52 = vadd.f32 %v571_v49, %v443_v48  ;;  %v448_v54 = vld [vmem:[%s2013_s21 + $0x140] sm:$0xff]  ;;  %v576_v55 = vld [vmem:[%s2013_s21 + $0x148] sm:$0xff]  ;;  %1495 = vmatprep.mubr.msk.f32.mxu1 %vm1837_vm0, %v1836_v32 }
  0x6c   : > { %v605_v53 = vadd.f32 %v573_v51, %v445_v50  ;;  %v446_v56 = vld [vmem:[%s2013_s21 + $0x120] sm:$0xff]  ;;  %v574_v57 = vld [vmem:[%s2013_s21 + $0x128] sm:$0xff]  ;;  %v608_v58 = vadd.f32 %v576_v55, %v448_v54  ;;  %v447_v60 = vld [vmem:[%s2013_s21 + $0x130] sm:$0xff] }
  0x6d   : > { %v606_v59 = vadd.f32 %v574_v57, %v446_v56  ;;  %v575_v61 = vld [vmem:[%s2013_s21 + $0x138] sm:$0xff]  ;;  %v449_v62 = vld [vmem:[%s2013_s21 + $0x150] sm:$0xff]  ;;  %v452_v2 = vld [vmem:[%s2013_s21 + $0x180] sm:$0xff] }
  0x6e   : > { %705 = vadd.xlane.f32.xlu1 %v597_v22  ;;  %v577_v63 = vld [vmem:[%s2013_s21 + $0x158] sm:$0xff]  ;;  %v607_v0 = vadd.f32 %v575_v61, %v447_v60  ;;  %v580_v3 = vld [vmem:[%s2013_s21 + $0x188] sm:$0xff]  ;;  %v450_v4 = vld [vmem:[%s2013_s21 + $0x160] sm:$0xff] }
  0x6f   : > { %703 = vadd.xlane.f32.xlu0 %v596_v23  ;;  %v609_v1 = vadd.f32 %v577_v63, %v449_v62  ;;  %v578_v5 = vld [vmem:[%s2013_s21 + $0x168] sm:$0xff]  ;;  %v612_v6 = vadd.f32 %v580_v3, %v452_v2  ;;  %v451_v8 = vld [vmem:[%s2013_s21 + $0x170] sm:$0xff]  ;;  %v579_v9 = vld [vmem:[%s2013_s21 + $0x178] sm:$0xff] }
  0x70   : > { %v610_v7 = vadd.f32 %v578_v5, %v450_v4  ;;  %v453_v10 = vld [vmem:[%s2013_s21 + $0x190] sm:$0xff]  ;;  %v581_v11 = vld [vmem:[%s2013_s21 + $0x198] sm:$0xff]  ;;  %v611_v12 = vadd.f32 %v579_v9, %v451_v8  ;;  %v456_v14 = vld [vmem:[%s2013_s21 + $0x1c0] sm:$0xff] }
  0x71   : > { %v613_v13 = vadd.f32 %v581_v11, %v453_v10  ;;  %v584_v15 = vld [vmem:[%s2013_s21 + $0x1c8] sm:$0xff]  ;;  %v454_v16 = vld [vmem:[%s2013_s21 + $0x1a0] sm:$0xff]  ;;  %v455_v20 = vld [vmem:[%s2013_s21 + $0x1b0] sm:$0xff] }
  0x72   : > { %701 = vadd.xlane.f32.xlu1 %v595_v28  ;;  %v582_v17 = vld [vmem:[%s2013_s21 + $0x1a8] sm:$0xff]  ;;  %v616_v18 = vadd.f32 %v584_v15, %v456_v14  ;;  %v583_v21 = vld [vmem:[%s2013_s21 + $0x1b8] sm:$0xff]  ;;  %v457_v22 = vld [vmem:[%s2013_s21 + $0x1d0] sm:$0xff] }
  0x73   : > { %693 = vadd.xlane.f32.xlu0 %v591_v29  ;;  %v614_v19 = vadd.f32 %v582_v17, %v454_v16  ;;  %v585_v23 = vld [vmem:[%s2013_s21 + $0x1d8] sm:$0xff]  ;;  %v615_v24 = vadd.f32 %v583_v21, %v455_v20  ;;  %v459_v26 = vld [vmem:[%s2013_s21 + $0x1f0] sm:$0xff]  ;;  %v458_v28 = vld [vmem:[%s2013_s21 + $0x1e0] sm:$0xff] }
  0x74   : > { %v617_v25 = vadd.f32 %v585_v23, %v457_v22  ;;  %v587_v27 = vld [vmem:[%s2013_s21 + $0x1f8] sm:$0xff]  ;;  %v586_v29 = vld [vmem:[%s2013_s21 + $0x1e8] sm:$0xff]  ;;  %v783_v36 = vld [vmem:[#allocation6] sm:$0xff]  ;;  %s1738_s21 = scalar_lea.vmem %s1277_s22, 128 }
  0x75   : > { %v619_v30 = vadd.f32 %v587_v27, %v459_v26  ;;  %v618_v31 = vadd.f32 %v586_v29, %v458_v28  ;;  %v786_v33 = vld [vmem:[#allocation6 + $0x18] sm:$0xff]  ;;  %v1088_v38 = vld [vmem:[#allocation8 + $0x70] sm:$0xff]  ;;  %v1087_v39 = vld [vmem:[#allocation8 + $0x68] sm:$0xff]  ;;  %p1739_p10 = scmp.ne.s32.totalorder %s1277_s22, %s1738_s21  ;;  %p1746_p6 = scmp.lt.s32.totalorder %s1744_s3, %s1738_s21 }
  0x76   : > { %711 = vadd.xlane.f32.xlu1 %v600_v34  ;;  %1453 = vmatpush3.msra.mxu0 %v786_v33  ;;  %v785_v34 = vld [vmem:[#allocation6 + $0x10] sm:$0xff]  ;;  %v1089_v37 = vld [vmem:[#allocation8 + $0x78] sm:$0xff]  ;;  %v1083_v43 = vld [vmem:[#allocation8 + $0x48] sm:$0xff] }
  0x77   : > { %707 = vadd.xlane.f32.xlu0 %v598_v35  ;;  %1454 = vmatprep.subr.mxu0 %v1836_v32  ;;  %v784_v35 = vld [vmem:[#allocation6 + $0x8] sm:$0xff]  ;;  %v1084_v42 = vld [vmem:[#allocation8 + $0x50] sm:$0xff]  ;;  %v1082_v44 = vld [vmem:[#allocation8 + $0x40] sm:$0xff]  ;;  %p1740_p2 = pnand %p1739_p10, %p1979_p0  ;;  %p1747_p9 = por %p1746_p6, %p1745_p7 }
  0x78   : > { %1455 = vmatpush3.msra.mxu0 %v785_v34  ;;  %1464 = vmatpush3.msra.mxu1 %v1089_v37  ;;  %v1081_v45 = vld [vmem:[#allocation8 + $0x38] sm:$0xff]  ;;  %v1078_v48 = vld [vmem:[#allocation8 + $0x20] sm:$0xff] }
  0x79   : > { %1456 = vmatprep.subr.mxu0 %v1836_v32  ;;  %1465 = vmatprep.subr.mxu1 %v1836_v32  ;;  %v1077_v49 = vld [vmem:[#allocation8 + $0x18] sm:$0xff]  ;;  %p1741_p11 = pneg %p1740_p2 }
  0x7a   : > { %709 = vadd.xlane.f32.xlu1 %v599_v40  ;;  %1457 = vmatpush3.msra.mxu0 %v784_v35  ;;  %v1086_v40 = vld [vmem:[#allocation8 + $0x60] sm:$0xff] }
  0x7b   : > { %713 = vadd.xlane.f32.xlu0 %v601_v41  ;;  %1458 = vmatprep.subr.mxu0 %v1836_v32  ;;  %v1085_v41 = vld [vmem:[#allocation8 + $0x58] sm:$0xff]  ;;  %p1748_p13 = pnand %p1747_p9, %p1741_p11 }
  0x7c   : > { %1459 = vmatpush3.msra.mxu0 %v783_v36  ;;  %1466 = vmatpush3.msra.mxu1 %v1088_v38 }
  0x7d   : > { %1498 = vmatprep.subr.mxu0 %v1836_v32  ;;  %1467 = vmatprep.subr.mxu1 %v1836_v32 }
  0x7e   : > { %719 = vadd.xlane.f32.xlu1 %v604_v46  ;;  %1468 = vmatpush3.msra.mxu1 %v1087_v39  ;;  %v1080_v46 = vld [vmem:[#allocation8 + $0x30] sm:$0xff] }
  0x7f   : > { %715 = vadd.xlane.f32.xlu0 %v602_v47  ;;  %1469 = vmatprep.subr.mxu1 %v1836_v32  ;;  %v1079_v47 = vld [vmem:[#allocation8 + $0x28] sm:$0xff] }
  0x80   : > { %1470 = vmatpush3.msra.mxu1 %v1086_v40 }
  0x81   : > { %1471 = vmatprep.subr.mxu1 %v1836_v32 }
  0x82   : > { %717 = vadd.xlane.f32.xlu1 %v603_v52  ;;  %1472 = vmatpush3.msra.mxu1 %v1085_v41 }
  0x83   : > { %721 = vadd.xlane.f32.xlu0 %v605_v53  ;;  %1473 = vmatprep.subr.mxu1 %v1836_v32 }
  0x84   : > { %1474 = vmatpush3.msra.mxu1 %v1084_v42 }
  0x85   : > { %1475 = vmatprep.subr.mxu1 %v1836_v32 }
  0x86   : > { %727 = vadd.xlane.f32.xlu1 %v608_v58  ;;  %1476 = vmatpush3.msra.mxu1 %v1083_v43 }
  0x87   : > { %723 = vadd.xlane.f32.xlu0 %v606_v59  ;;  %1477 = vmatprep.subr.mxu1 %v1836_v32 }
  0x88   : > { %1478 = vmatpush3.msra.mxu1 %v1082_v44 }
  0x89   : > { %1479 = vmatprep.subr.mxu1 %v1836_v32 }
  0x8a   : > { %725 = vadd.xlane.f32.xlu1 %v607_v0  ;;  %1480 = vmatpush3.msra.mxu1 %v1081_v45  ;;  %v826_v0 = vlaneseq }
  0x8b   : > { %729 = vadd.xlane.f32.xlu0 %v609_v1  ;;  %1481 = vmatprep.subr.mxu1 %v1836_v32 }
  0x8c   : > { %1482 = vmatpush3.msra.mxu1 %v1080_v46  ;;  %v827_v3 = vand.u32 127, %v826_v0 }
  0x8d   : > { %1483 = vmatprep.subr.mxu1 %v1836_v32 }
  0x8e   : > { %735 = vadd.xlane.f32.xlu1 %v612_v6  ;;  %1484 = vmatpush3.msra.mxu1 %v1079_v47  ;;  %v829_v6 = vshrl.u32 %v826_v0, 7  ;;  %v839_v8 = vadd.s32 4294967280, %v827_v3  ;;  %v846_v9 = vadd.s32 4294967272, %v827_v3 }
  0x8f   : > { %731 = vadd.xlane.f32.xlu0 %v610_v7  ;;  %1485 = vmatprep.subr.mxu1 %v1836_v32  ;;  %v832_v7 = vadd.s32 4294967288, %v827_v3 }
  0x90   : > { %1486 = vmatpush3.msra.mxu1 %v1078_v48  ;;  %v2122_v16 = vsub.s32 %v839_v8, %v829_v6  ;;  %v2124_v17 = vsub.s32 %v846_v9, %v829_v6 }
  0x91   : > { %1487 = vmatprep.subr.mxu1 %v1836_v32 }
  0x92   : > { %733 = vadd.xlane.f32.xlu1 %v611_v12  ;;  %1488 = vmatpush3.msra.mxu1 %v1077_v49  ;;  %v2118_v12 = vsub.s32 %v827_v3, %v829_v6 }
  0x93   : > { %737 = vadd.xlane.f32.xlu0 %v613_v13  ;;  %1489 = vmatprep.subr.mxu1 %v1836_v32  ;;  %v2120_v13 = vsub.s32 %v832_v7, %v829_v6 }
  0x96   : > { %743 = vadd.xlane.f32.xlu1 %v616_v18 }
  0x97   : > { %739 = vadd.xlane.f32.xlu0 %v614_v19 }
  0x9a   : > { %741 = vadd.xlane.f32.xlu1 %v615_v24 }
  0x9b   : > { %745 = vadd.xlane.f32.xlu0 %v617_v25 }
  0x9e   : > { %749 = vadd.xlane.f32.xlu1 %v619_v30 }
  0x9f   : > { %747 = vadd.xlane.f32.xlu0 %v618_v31 }
  0xeb   : > { %v696_v50 = vpop.xlane.xlu1 %695 }
  0xec   : > { %v688_v51 = vpop.xlane.xlu0 %687  ;;  %v755_v23 = vmul.f32 0.00390625, %v696_v50 }
  0xed   : > { %v751_v24 = vmul.f32 0.00390625, %v688_v51 }
  0xee   : > { %v856_v38 = vrot.slane %v755_v23, %v2118_v12 }
  0xef   : > { %v698_v52 = vpop.xlane.xlu1 %697  ;;  %v831_v39 = vrot.slane %v751_v24, %v2118_v12 }
  0xf0   : > { %v690_v53 = vpop.xlane.xlu0 %689  ;;  %v756_v14 = vmul.f32 0.00390625, %v698_v52 }
  0xf1   : > { %v752_v15 = vmul.f32 0.00390625, %v690_v53 }
  0xf2   : > { %v860_v29 = vrot.slane %v756_v14, %v2120_v13 }
  0xf3   : > { %v700_v54 = vpop.xlane.xlu1 %699  ;;  %v836_v30 = vrot.slane %v752_v15, %v2120_v13 }
  0xf4   : > { %v692_v55 = vpop.xlane.xlu0 %691  ;;  %v757_v18 = vmul.f32 0.00390625, %v700_v54  ;;  %v861_v44 = vsel %vm837_vm1, %v860_v29, %v856_v38 }
  0xf5   : > { %v753_v19 = vmul.f32 0.00390625, %v692_v55  ;;  %v838_v45 = vsel %vm837_vm1, %v836_v30, %v831_v39 }
  0xf6   : > { %v865_v33 = vrot.slane %v757_v18, %v2122_v16 }
  0xf7   : > { %v706_v56 = vpop.xlane.xlu1 %705  ;;  %v843_v34 = vrot.slane %v753_v19, %v2122_v16 }
  0xf8   : > { %v704_v57 = vpop.xlane.xlu0 %703  ;;  %v760_v20 = vmul.f32 0.00390625, %v706_v56  ;;  %v866_v48 = vsel %vm844_vm2, %v865_v33, %v861_v44 }
  0xf9   : > { %v759_v21 = vmul.f32 0.00390625, %v704_v57  ;;  %v845_v49 = vsel %vm844_vm2, %v843_v34, %v838_v45 }
  0xfa   : > { %v879_v35 = vrot.slane %v760_v20, %v2120_v13 }
  0xfb   : > { %v702_v58 = vpop.xlane.xlu1 %701  ;;  %v875_v36 = vrot.slane %v759_v21, %v2118_v12 }
  0xfc   : > { %v694_v59 = vpop.xlane.xlu0 %693  ;;  %v758_v25 = vmul.f32 0.00390625, %v702_v58 }
  0xfd   : > { %v754_v26 = vmul.f32 0.00390625, %v694_v59  ;;  %v880_v50 = vsel %vm837_vm1, %v879_v35, %v875_v36 }
  0xfe   : > { %v870_v40 = vrot.slane %v758_v25, %v2124_v17 }
  0xff   : > { %v712_v60 = vpop.xlane.xlu1 %711  ;;  %v850_v41 = vrot.slane %v754_v26, %v2124_v17 }
 0x100   : > { %v708_v61 = vpop.xlane.xlu0 %707  ;;  %v871_v52 = vsel %vm851_vm3, %v870_v40, %v866_v48  ;;  %v763_v54 = vmul.f32 0.00390625, %v712_v60 }
 0x101   : > { %v761_v28 = vmul.f32 0.00390625, %v708_v61  ;;  %v852_v53 = vsel %vm851_vm3, %v850_v41, %v845_v49 }
 0x102   : > { %v987_v61 = vsel %vm986_vm4, %v871_v52, %v852_v53  ;;  %v894_v6 = vrot.slane %v763_v54, %v2118_v12 }
 0x103   : > { %v710_v62 = vpop.xlane.xlu1 %709  ;;  %v884_v43 = vrot.slane %v761_v28, %v2122_v16 }
 0x104   : > { %v714_v63 = vpop.xlane.xlu0 %713  ;;  %v762_v31 = vmul.f32 0.00390625, %v710_v62 }
 0x105   : > { %v764_v47 = vmul.f32 0.00390625, %v714_v63  ;;  %v885_v57 = vsel %vm844_vm2, %v884_v43, %v880_v50 }
 0x106   : > { %v889_v46 = vrot.slane %v762_v31, %v2124_v17 }
 0x107   : > { %v2114_v1 = vpop.xlane.xlu1 %719  ;;  %v898_v59 = vrot.slane %v764_v47, %v2120_v13 }
 0x108   : > { %v716_v2 = vpop.xlane.xlu0 %715  ;;  %v890_v58 = vsel %vm851_vm3, %v889_v46, %v885_v57  ;;  %v767_v62 = vmul.f32 0.00390625, %v2114_v1 }
 0x109   : > { %v765_v55 = vmul.f32 0.00390625, %v716_v2  ;;  %v989_v9 = vsel %vm988_vm5, %v890_v58, %v987_v61  ;;  %v899_v19 = vsel %vm837_vm1, %v898_v59, %v894_v6  ;;  %v1182_v6 = vld [vmem:[#allocation9 + $0x70] sm:$0xff] }
 0x10a   : > { %v913_v20 = vrot.slane %v767_v62, %v2118_v12 }
 0x10b   : > { %v718_v4 = vpop.xlane.xlu1 %717  ;;  %v903_v7 = vrot.slane %v765_v55, %v2122_v16 }
 0x10c   : > { %v722_v5 = vpop.xlane.xlu0 %721  ;;  %v766_v63 = vmul.f32 0.00390625, %v718_v4 }
 0x10d   : > { %v768_v0 = vmul.f32 0.00390625, %v722_v5  ;;  %v904_v25 = vsel %vm844_vm2, %v903_v7, %v899_v19  ;;  %v1181_v7 = vld [vmem:[#allocation9 + $0x68] sm:$0xff] }
 0x10e   : > { %v908_v21 = vrot.slane %v766_v63, %v2124_v17  ;;  %v1075_v63 = vld [vmem:[#allocation8 + $0x8] sm:$0xff] }
 0x10f   : > { %v2116_v10 = vpop.xlane.xlu1 %727  ;;  %v1173_v19 = vld [vmem:[#allocation9 + $0x28] sm:$0xff] }
 0x110   : > { %v724_v11 = vpop.xlane.xlu0 %723  ;;  %v771_v1 = vmul.f32 0.00390625, %v2116_v10 }
 0x111   : > { %v769_v60 = vmul.f32 0.00390625, %v724_v11  ;;  %v917_v11 = vrot.slane %v768_v0, %v2120_v13  ;;  %v1074_v0 = vld [vmem:[#allocation8] sm:$0xff] }
 0x112   : > { %v932_v33 = vrot.slane %v771_v1, %v2118_v12  ;;  %v1172_v1 = vld [vmem:[#allocation9 + $0x20] sm:$0xff] }
 0x113   : > { %v726_v22 = vpop.xlane.xlu1 %725  ;;  %v918_v38 = vsel %vm837_vm1, %v917_v11, %v913_v20 }
 0x114   : > { %v730_v27 = vpop.xlane.xlu0 %729  ;;  %v770_v14 = vmul.f32 0.00390625, %v726_v22  ;;  %v922_v22 = vrot.slane %v769_v60, %v2122_v16  ;;  %v1180_v60 = vld [vmem:[#allocation9 + $0x60] sm:$0xff] }
 0x115   : > { %v772_v2 = vmul.f32 0.00390625, %v730_v27 }
 0x116   : > { %v927_v10 = vrot.slane %v770_v14, %v2124_v17  ;;  %v1176_v14 = vld [vmem:[#allocation9 + $0x40] sm:$0xff] }
 0x117   : > { %v736_v37 = vpop.xlane.xlu1 %735  ;;  %v936_v26 = vrot.slane %v772_v2, %v2120_v13  ;;  %v1179_v2 = vld [vmem:[#allocation9 + $0x58] sm:$0xff] }
 0x118   : > { %v732_v42 = vpop.xlane.xlu0 %731  ;;  %v775_v23 = vmul.f32 0.00390625, %v736_v37  ;;  %v909_v37 = vsel %vm851_vm3, %v908_v21, %v904_v25  ;;  %v1169_v25 = vld [vmem:[#allocation9 + $0x8] sm:$0xff] }
 0x119   : > { %v773_v15 = vmul.f32 0.00390625, %v732_v42  ;;  %v923_v42 = vsel %vm844_vm2, %v922_v22, %v918_v38  ;;  %v937_v43 = vsel %vm837_vm1, %v936_v26, %v932_v33  ;;  %v991_v55 = vsel %vm990_vm6, %v909_v37, %v989_v9  ;;  %v1177_v9 = vld [vmem:[#allocation9 + $0x48] sm:$0xff]  ;;  %v1168_v22 = vld [vmem:[#allocation9] sm:$0xff] }
 0x11a   : > { %v951_v39 = vrot.slane %v775_v23, %v2118_v12  ;;  %v928_v47 = vsel %vm851_vm3, %v927_v10, %v923_v42  ;;  %v1405_v26 = vld [vmem:[%s2266_s4] ss:$0 sm:$0xff] }
 0x11b   : > { %v734_v51 = vpop.xlane.xlu1 %733  ;;  %v941_v29 = vrot.slane %v773_v15, %v2122_v16  ;;  %v993_v57 = vsel %vm992_vm7, %v928_v47, %v991_v55  ;;  %v1175_v15 = vld [vmem:[#allocation9 + $0x38] sm:$0xff] }
 0x11c   : > { %v738_v56 = vpop.xlane.xlu0 %737  ;;  %v774_v4 = vmul.f32 0.00390625, %v734_v51 }
 0x11d   : > { %v776_v18 = vmul.f32 0.00390625, %v738_v56  ;;  %v942_v48 = vsel %vm844_vm2, %v941_v29, %v937_v43 }
 0x11e   : > { %v946_v34 = vrot.slane %v774_v4, %v2124_v17  ;;  %v1171_v4 = vld [vmem:[#allocation9 + $0x18] sm:$0xff] }
 0x11f   : > { %v744_v3 = vpop.xlane.xlu1 %743  ;;  %v955_v30 = vrot.slane %v776_v18, %v2120_v13  ;;  %v1174_v18 = vld [vmem:[#allocation9 + $0x30] sm:$0xff] }
 0x120   : > { %v740_v8 = vpop.xlane.xlu0 %739  ;;  %v779_v35 = vmul.f32 0.00390625, %v744_v3  ;;  %v947_v51 = vsel %vm851_vm3, %v946_v34, %v942_v48  ;;  %v1183_v3 = vld [vmem:[#allocation9 + $0x78] sm:$0xff] }
 0x121   : > { %v777_v5 = vmul.f32 0.00390625, %v740_v8  ;;  %v956_v49 = vsel %vm837_vm1, %v955_v30, %v951_v39  ;;  %v1178_v8 = vld [vmem:[#allocation9 + $0x50] sm:$0xff]  ;;  %v1406_v30 = vld [vmem:[%s2268_s6] ss:$0 sm:$0xff] }
 0x122   : > { %v970_v52 = vrot.slane %v779_v35, %v2118_v12  ;;  %v995_v12 = vsel %vm994_vm8, %v947_v51, %v993_v57 }
 0x123   : > { %v742_v24 = vpop.xlane.xlu1 %741  ;;  %v960_v36 = vrot.slane %v777_v5, %v2122_v16  ;;  %v1403_v5 = vld [vmem:[%s2264_s2] ss:$0 sm:$0xff] }
 0x124   : > { %v778_v27 = vmul.f32 0.00390625, %v742_v24  ;;  %v746_v28 = vpop.xlane.xlu0 %745  ;;  %v1170_v24 = vld [vmem:[#allocation9 + $0x10] sm:$0xff] }
 0x125   : > { %v780_v31 = vmul.f32 0.00390625, %v746_v28  ;;  %v961_v53 = vsel %vm844_vm2, %v960_v36, %v956_v49 }
 0x126   : > { %v965_v40 = vrot.slane %v778_v27, %v2124_v17 }
 0x127   : > { %v750_v41 = vpop.xlane.xlu1 %749  ;;  %v974_v44 = vrot.slane %v780_v31, %v2120_v13 }
 0x128   : > { %v748_v45 = vpop.xlane.xlu0 %747  ;;  %v782_v46 = vmul.f32 0.00390625, %v750_v41  ;;  %v966_v13 = vsel %vm851_vm3, %v965_v40, %v961_v53 }
 0x129   : > { %v781_v50 = vmul.f32 0.00390625, %v748_v45  ;;  %v975_v58 = vsel %vm837_vm1, %v974_v44, %v970_v52 }
 0x12a   : > { %v984_v54 = vrot.slane %v782_v46, %v2124_v17  ;;  %v997_v17 = vsel %vm996_vm9, %v966_v13, %v995_v12 }
 0x12b   : > { %v979_v56 = vrot.slane %v781_v50, %v2122_v16  ;;  %v1076_v16 = vld [vmem:[#allocation8 + $0x10] sm:$0xff] }
 0x12c   : > { %1490 = vmatpush3.msra.mxu1 %v1076_v16 }
 0x12d   : > { %v980_v59 = vsel %vm844_vm2, %v979_v56, %v975_v58  ;;  %1491 = vmatprep.subr.mxu1 %v1836_v32 }
 0x12e   : > { %v985_v61 = vsel %vm851_vm3, %v984_v54, %v980_v59  ;;  %1492 = vmatpush3.msra.mxu1 %v1075_v63 }
 0x12f   : > { %v999_v62 = vsel %vm998_vm10, %v985_v61, %v997_v17  ;;  %1493 = vmatprep.subr.mxu1 %v1836_v32 }
 0x130   : > { %1461 = vmatmul.mubr.msk.f32.vlgmr.msra.gmra.mxu0 %vm1000_vm11, %v999_v62  ;;  %1494 = vmatpush3.msra.mxu1 %v1074_v0 }
 0x131   : > { %1530 = vmatprep.mubr.msk.f32.mxu0 %vm1837_vm0, %v1836_v32  ;;  %1499 = vmatpush3.msra.mxu0 %v1183_v3 }
 0x132   : > { %1500 = vmatprep.subr.mxu0 %v1836_v32 }
 0x133   : > { %1501 = vmatpush3.msra.mxu0 %v1182_v6 }
 0x134   : > { %1502 = vmatprep.subr.mxu0 %v1836_v32 }
 0x135   : > { %1503 = vmatpush3.msra.mxu0 %v1181_v7 }
 0x136   : > { %1504 = vmatprep.subr.mxu0 %v1836_v32 }
 0x137   : > { %1505 = vmatpush3.msra.mxu0 %v1180_v60 }
 0x138   : > { %1506 = vmatprep.subr.mxu0 %v1836_v32 }
 0x139   : > { %1507 = vmatpush3.msra.mxu0 %v1179_v2 }
 0x13a   : > { %1508 = vmatprep.subr.mxu0 %v1836_v32 }
 0x13b   : > { %1509 = vmatpush3.msra.mxu0 %v1178_v8 }
 0x13c   : > { %1510 = vmatprep.subr.mxu0 %v1836_v32 }
 0x13d   : > { %1511 = vmatpush3.msra.mxu0 %v1177_v9 }
 0x13e   : > { %1512 = vmatprep.subr.mxu0 %v1836_v32 }
 0x13f   : > { %1513 = vmatpush3.msra.mxu0 %v1176_v14 }
 0x140   : > { %1514 = vmatprep.subr.mxu0 %v1836_v32 }
 0x141   : > { %1515 = vmatpush3.msra.mxu0 %v1175_v15 }
 0x142   : > { %1516 = vmatprep.subr.mxu0 %v1836_v32 }
 0x143   : > { %1517 = vmatpush3.msra.mxu0 %v1174_v18 }
 0x144   : > { %1518 = vmatprep.subr.mxu0 %v1836_v32 }
 0x145   : > { %1519 = vmatpush3.msra.mxu0 %v1173_v19 }
 0x146   : > { %1520 = vmatprep.subr.mxu0 %v1836_v32 }
 0x147   : > { %1521 = vmatpush3.msra.mxu0 %v1172_v1 }
 0x148   : > { %1522 = vmatprep.subr.mxu0 %v1836_v32 }
 0x149   : > { %1523 = vmatpush3.msra.mxu0 %v1171_v4 }
 0x14a   : > { %1524 = vmatprep.subr.mxu0 %v1836_v32 }
 0x14b   : > { %1525 = vmatpush3.msra.mxu0 %v1170_v24 }
 0x14c   : > { %1526 = vmatprep.subr.mxu0 %v1836_v32 }
 0x14d   : > { %1527 = vmatpush3.msra.mxu0 %v1169_v25 }
 0x14e   : > { %1528 = vmatprep.subr.mxu0 %v1836_v32 }
 0x14f   : > { %1529 = vmatpush3.msra.mxu0 %v1168_v22 }
 0x1f0   : > { %v1069_v20 = vpop.f32.mrf.mxu0 }
 0x1f1   : > { %v1070_v21 = vadd.f32 %v1403_v5, %v1069_v20 }
 0x1f2   : > { %v1462_v11 = vpop.f32.mrf.mxu0 }
 0x1f3   : > { %v1073_v23 = vmax.f32 %v1070_v21, 0.0 }
 0x1f5   : > { %1496 = vmatmul.mubr.f32.vlgmr.msra.gmra.mxu1 %v1073_v23 }
 0x2b5   : > { %v1163_v27 = vpop.f32.mrf.mxu1 }
 0x2b6   : > { %v1164_v28 = vadd.f32 %v1405_v26, %v1163_v27 }
 0x2b7   : > { %v1497_v10 = vpop.f32.mrf.mxu1 }
 0x2b8   : > { %v1167_v29 = vmax.f32 %v1164_v28, 0.0 }
 0x2ba   : > { %1531 = vmatmul.mubr.f32.vlgmr.msra.gmra.mxu0 %v1167_v29 }
 0x37a   : > { %v1257_v32 = vpop.f32.mrf.mxu0 }
 0x37b   : > { %v1258_v31 = vadd.f32 %v1406_v30, %v1257_v32 }
 0x37c   : > { %v1532_v33 = vpop.f32.mrf.mxu0 }
 0x37d   : > { %1261 = vst [vmem:[%s357_s18] sm:$0xff] %v1258_v31 }
 0x37e   : > { %1751 = shalt.err (!%p1748_p13)
}
 0x37f   : > { %s1752_s9 = scalar_lea.hbm %s2220_s15, 128  ;;  %s1756_s13 = scalar_lea.hbm %s2269_s7, 256 }
 0x380   : > { %p1753_p1 = scmp.ne.s32.totalorder %s2220_s15, %s1752_s9  ;;  %p1757_p12 = scmp.lt.s32.totalorder %s2220_s15, %s2269_s7 }
 0x381   : > { %p1758_p5 = scmp.lt.s32.totalorder %s1756_s13, %s1752_s9 }
 0x382   : > { %p1754_p4 = pnand %p1753_p1, %p1979_p0 }
 0x383   : > { %p1759_p3 = por %p1758_p5, %p1757_p12 }
 0x384   : > { %p1755_p8 = pneg %p1754_p4 }
 0x386   : > { %p1760_p10 = pnand %p1759_p3, %p1755_p8 }
 0x388   : > { %1763 = shalt.err (!%p1760_p10)
}
 0x389   : > { %1547 = dma.vmem_to_hbm [thread:$0]  (%p1979_p0), %s1277_s22, 128, %s2220_s15, %s1263_s5  }
 0x38a PF: > { %s1288_s17 = sand.u32 1, %s1806_s24   ;;  %p2291_p2 = scmp.ne.s32.totalorder %s2280_s12, 0 }
 0x38b   : > { %p2292_p11 = scmp.ge.s32.totalorder %s1826_s29, 2  ;;  %s1289_s18 = scalar_lea.sflag [#allocation5], %s1288_s17 }
 0x38d   : > { %p1564_p7 = pnand %p2292_p11, %p2291_p2 }
 0x38f   : > { %p1565_p6 = pneg %p1564_p7 }
 0x391   : > { %1801 = dma.done.wait (%p1565_p6), %s1289_s18, 128  }
 0x392   : > { %1803 = vsyncadd (%p1565_p6), %s1289_s18, 4294967168  ;;  %s25_s29 = sadd.s32 1, %s1826_s29   ;;  %s2293_s24 = smov %s1810_s25 }
 0x393   : > { %p22_p9 = scmp.ge.s32.totalorder %s25_s29, 4   ;;  %s2294_s25 = smov %s1814_s26 }
 0x394   : > { %s2295_s26 = smov %s1991_s23  ;;  %s2296_s27 = smov %s1822_s28 }
 0x395   : > { %s2297_s28 = smov %s2299_s8  ;;  %24 = sbr.rel (!%p22_p9) target bundleno = 12 (0xc), region = 113 }
 0x39a   :  { %1294 = vsyncpa [#allocation4], 1 }
 0x39b   :  { %1296 = vsyncpa [#allocation4 + $0x1], 1 }
 0x39c   :  { %1297 = vsyncpa [#allocation7], 1 }
 0x39d   :  { %1298 = vsyncpa [#allocation10], 1 }
 0x39e   :  { %1299 = vsyncpa [#allocation5], 1 }
 0x39f   :  { %1301 = vsyncpa [#allocation5 + $0x1], 1 }

</bundles_post_ra>
